<compile_context>
chip_gen: v7x
topology: tpu7x:2x2x1
jax: 0.10.0
libtpu: 0.0.40
codegen_flags: <defaults>
</compile_context>

<pallas_src>
import functools
import math

import jax
import jax.numpy as jnp
from jax import lax
from jax.experimental import pallas as pl
from jax.experimental.pallas import tpu as pltpu


_MAX_BLOCK_ELEMS = 1280 * 1024      # per-input elements per grid step (~5 MiB f32)
_VMEM_LIMIT = 40 * 1024 * 1024      # 4 input buffers + f32 accumulator < ~27 MiB
_MAX_UNIT = 4096                    # largest lcm(C, 128) handled lane-dense
_FB_MAX_ELEMS = 1 << 20             # fallback: padded elements per input block


def _mae_sum_kernel(p_ref, t_ref, out_ref, acc_ref, *, n_row, tn, out_w,
                    needs_mask):
    """Accumulate sum(|p - t|) along the flattened per-row reduction axis.

    Grid: (row blocks ["parallel"], reduction blocks ["arbitrary"]).
    p/t blocks are (TB, TN) slices of the (rows, n_row) view; acc is a
    (TB, TN) f32 VMEM scratch.  The output block is (TB, out_w) partial sums
    where lane j always holds channel j % C (tn and out_w are multiples of C).
    """
    k = pl.program_id(1)
    nk = pl.num_programs(1)

    @pl.when(k == 0)
    def _zero():
        acc_ref[...] = jnp.zeros_like(acc_ref)

    # Whole-tile elementwise chain: sub/abs run in the input dtype (bf16 stays
    # packed on v6e/v7x), with a single cast to f32 right before accumulation.
    # No manual partial-register tree / chunk unroll: the compiler schedules
    # independent per-vreg chains with bounded live ranges.
    ae = jnp.abs(p_ref[...] - t_ref[...]).astype(jnp.float32)
    if needs_mask:
        # Only the last reduction block has lanes past the end of the row;
        # `limit >= tn` everywhere else so the select is a no-op there.  One
        # iota per grid step (nothing re-materialized per chunk).
        limit = n_row - k * tn
        lane = lax.broadcasted_iota(jnp.int32, ae.shape, 1)
        ae = jnp.where(lane < limit, ae, 0.0)
    acc_ref[...] += ae

    @pl.when(k == nk - 1)
    def _finalize():
        # Fold the TN-wide accumulator down to out_w lanes.  out_w | tn and
        # both are multiples of C, so lane j of the result is channel j % C.
        red = acc_ref[:, 0:out_w]
        for g in range(1, tn // out_w):
            red = red + acc_ref[:, g * out_w:(g + 1) * out_w]
        out_ref[...] = red
        # Rows past the real batch extent (padded row block) hold garbage but
        # are dropped by Pallas on writeback of the partial output block.


def _mae_sum_kernel_3d(p_ref, t_ref, out_ref, acc_ref, *, L, tl, needs_mask):
    """Fallback for pathological C: (TB, TL, C) blocks, reduce over axis 1."""
    k = pl.program_id(1)

    @pl.when(k == 0)
    def _zero():
        acc_ref[...] = jnp.zeros_like(acc_ref)

    ae = jnp.abs(p_ref[...] - t_ref[...]).astype(jnp.float32)
    if needs_mask:
        row = k * tl + lax.broadcasted_iota(jnp.int32, ae.shape, 1)
        ae = jnp.where(row < L, ae, 0.0)
    acc_ref[...] += jnp.sum(ae, axis=1)

    @pl.when(k == pl.num_programs(1) - 1)
    def _finalize():
        out_ref[...] = acc_ref[...]


def _pick_unit(C):
    """Lane-group width (multiple of C) for the lane-dense path, else None."""
    if C % 128 == 0:
        return C
    if 128 % C == 0:
        return 128
    u = (C * 128) // math.gcd(C, 128)
    return u if u <= _MAX_UNIT else None


def _pick_fold(B, L, C):
    """Divisor R of L folded into the row axis (free reshape) so blocks use all
    8 sublanes and the 'parallel' row axis has >= 2 blocks (v7x megacore)."""
    if B >= 16 or L <= 1:
        return 1
    best = 1
    for d in range(2, min(L, max(1, 1024 // B)) + 1):
        if L % d != 0:
            continue
        if (L // d) * C < 128:      # rows would no longer fill a vreg's lanes
            break
        best = d
        if B * d >= 16:             # enough rows for two 8-row blocks
            break
    return best


@jax.jit
def mae_loss(pred, true, w_channel):
    """Returns (w_channel[None,:] * mae, mae) with mae = mean(|pred-true|, axis=1)."""
    B, L, C = pred.shape
    itemsize = pred.dtype.itemsize
    mae_dtype = pred.dtype
    wmae_dtype = jnp.promote_types(pred.dtype, jnp.float32)

    unit = _pick_unit(C)
    if unit is not None:
        # ---- lane-dense path over the flattened (L*C) axis ------------------
        R = _pick_fold(B, L, C)
        rows = B * R
        n_row = (L // R) * C

        # Rows per block: full when small; otherwise a multiple of 8 giving at
        # least two row blocks (both v7x TensorCores), grown when rows are
        # short so blocks still reach the target volume.
        if rows < 16:
            tb = rows
        else:
            tb = min(rows // 2, max(8, _MAX_BLOCK_ELEMS // n_row), 2048)
            tb = max(8, (tb // 8) * 8)

        # Lanes per block: a multiple of `unit` (so lane j is always channel
        # j % C), bounded by the per-step element budget.  ~1.25M elements per
        # buffer => 2 inputs x 2 pipeline buffers + f32 acc < ~27 MiB VMEM.
        if n_row <= unit:
            tn = n_row                       # single reduction step, full row
        else:
            max_tn = max(unit, _MAX_BLOCK_ELEMS // tb)
            tn = max(unit, (min(max_tn, n_row) // unit) * unit)
        out_w = min(unit, tn)
        needs_mask = (n_row % tn) != 0
        grid = (pl.cdiv(rows, tb), pl.cdiv(n_row, tn))

        kernel = functools.partial(_mae_sum_kernel, n_row=n_row, tn=tn,
                                   out_w=out_w, needs_mask=needs_mask)
        sums = pl.pallas_call(
            kernel,
            out_shape=jax.ShapeDtypeStruct((rows, out_w), jnp.float32),
            grid=grid,
            in_specs=[pl.BlockSpec((tb, tn), lambda i, k: (i, k)),
                      pl.BlockSpec((tb, tn), lambda i, k: (i, k))],
            out_specs=pl.BlockSpec((tb, out_w), lambda i, k: (i, 0)),
            scratch_shapes=[pltpu.VMEM((tb, tn), jnp.float32)],
            compiler_params=pltpu.CompilerParams(
                dimension_semantics=("parallel", "arbitrary"),
                vmem_limit_bytes=_VMEM_LIMIT),
            cost_estimate=pl.CostEstimate(
                flops=3 * B * L * C, transcendentals=0,
                bytes_accessed=2 * B * L * C * itemsize + rows * out_w * 4),
        )(pred.reshape(rows, n_row), true.reshape(rows, n_row))
        # Lane j of `sums` is channel j % C; fold lanes and the row fold R.
        sums_bc = sums.reshape(B, R * (out_w // C), C).sum(axis=1)
    else:
        # ---- generic fallback for pathological C (lcm(C, 128) > _MAX_UNIT) --
        if B < 16:
            tb = B
        else:
            tb = max(8, (min(B // 2, 64) // 8) * 8)
        cp = ((C + 127) // 128) * 128        # lane-PADDED channel width in VMEM
        tl = min(L, max(1, _FB_MAX_ELEMS // (tb * cp)))
        if tl < L:
            tl = max(8, (tl // 8) * 8)
        needs_mask = (L % tl) != 0
        grid = (pl.cdiv(B, tb), pl.cdiv(L, tl))
        kernel = functools.partial(_mae_sum_kernel_3d, L=L, tl=tl,
                                   needs_mask=needs_mask)
        sums_bc = pl.pallas_call(
            kernel,
            out_shape=jax.ShapeDtypeStruct((B, C), jnp.float32),
            grid=grid,
            in_specs=[pl.BlockSpec((tb, tl, C), lambda i, k: (i, k, 0)),
                      pl.BlockSpec((tb, tl, C), lambda i, k: (i, k, 0))],
            out_specs=pl.BlockSpec((tb, C), lambda i, k: (i, 0)),
            scratch_shapes=[pltpu.VMEM((tb, C), jnp.float32)],
            compiler_params=pltpu.CompilerParams(
                dimension_semantics=("parallel", "arbitrary"),
                vmem_limit_bytes=_VMEM_LIMIT),
            cost_estimate=pl.CostEstimate(
                flops=3 * B * L * C, transcendentals=0,
                bytes_accessed=2 * B * L * C * itemsize + B * C * 4),
        )(pred, true)

    # Tiny (B, C)-sized epilogue: mean over L, channel weighting, dtype casts.
    mae32 = sums_bc * (1.0 / L)
    mae = mae32.astype(mae_dtype)
    wmae = (w_channel.astype(jnp.float32)[None, :] * mae32).astype(wmae_dtype)
    return wmae, mae


if __name__ == "__main__":
    key = jax.random.PRNGKey(0)
    cases = [
        # (B, L, C, input dtype, tolerance)
        (2, 8, 4, jnp.float32, 1e-5),     # tiny, single block
        (2, 600, 4, jnp.float32, 1e-5),   # row fold (R=8), 2 row blocks, masked tail
        (3, 256, 4, jnp.bfloat16, 3e-2),  # native bf16 inputs, f32 accumulation
        (2, 16, 5, jnp.float32, 1e-5),    # awkward C via unit=lcm(5,128), single step
        (16, 600, 5, jnp.float32, 1e-5),  # awkward C, tiled reduction + lane mask
        (20, 48, 4, jnp.float32, 1e-5),   # B not a multiple of 8: padded row block
        (2, 64, 33, jnp.float32, 1e-5),   # pathological C -> 3D fallback path
    ]
    for (B, L, C, dtype, tol) in cases:
        key, k1, k2 = jax.random.split(key, 3)
        pred = jax.random.normal(k1, (B, L, C), dtype=jnp.float32).astype(dtype)
        true = jax.random.normal(k2, (B, L, C), dtype=jnp.float32).astype(dtype)
        # __init__: w_channel = ones(C) / sum(ones(C))
        w_channel = jnp.ones((C,), dtype=jnp.float32)
        w_channel = w_channel / jnp.sum(w_channel)

        wmae, mae = mae_loss(pred, true, w_channel)
        jax.block_until_ready((wmae, mae))

        # Plain-JAX reference (f32).
        mae_ref = jnp.mean(
            jnp.abs(pred.astype(jnp.float32) - true.astype(jnp.float32)), axis=1)
        wmae_ref = w_channel[None, :] * mae_ref
        assert jnp.allclose(mae.astype(jnp.float32), mae_ref,
                            rtol=tol, atol=tol), ("mae mismatch", B, L, C, dtype)
        assert jnp.allclose(wmae.astype(jnp.float32), wmae_ref,
                            rtol=tol, atol=tol), ("wmae mismatch", B, L, C, dtype)

    print("KERNEL_OK")
</pallas_src>

<mosaic_0001>
module attributes {stable_mosaic.version = 11 : i64} {
  func.func @_mae_sum_kernel(%arg0: i32, %arg1: i32, %arg2: memref<2x32xf32, #tpu.memory_space<vmem>>, %arg3: memref<2x32xf32, #tpu.memory_space<vmem>>, %arg4: memref<2x32xf32, #tpu.memory_space<vmem>>, %arg5: memref<2x32xf32, #tpu.memory_space<vmem>>) attributes {dimension_semantics = [#tpu.dimension_semantics<parallel>, #tpu.dimension_semantics<arbitrary>], iteration_bounds = array<i64: 1, 1>, scalar_prefetch = 0 : i64, scratch_operands = 1 : i64, tpu.core_type = #tpu.core_type<tc>, window_params = [{transform_indices = @transform_0, window_bounds = array<i64: 2, 32>}, {transform_indices = @transform_1, window_bounds = array<i64: 2, 32>}, {transform_indices = @transform_2, window_bounds = array<i64: 2, 32>}]} {
    %c0_i32 = arith.constant 0 : i32
    %0 = arith.cmpi eq, %arg1, %c0_i32 : i32
    %1 = arith.extui %0 : i1 to i32
    %c0_i32_0 = arith.constant 0 : i32
    %2 = arith.cmpi ne, %1, %c0_i32_0 : i32
    scf.if %2 {
      %cst = arith.constant 0.000000e+00 : f32
      %13 = vector.broadcast %cst : f32 to vector<2x32xf32>
      %c0_10 = arith.constant 0 : index
      %c0_11 = arith.constant 0 : index
      %14 = vector.load %arg5[%c0_10, %c0_11] : memref<2x32xf32, #tpu.memory_space<vmem>>, vector<2x32xf32>
      tpu.vector_store %arg5[%c0_10, %c0_11], %13 {strides = array<i32>} : memref<2x32xf32, #tpu.memory_space<vmem>>, vector<2x32xf32>,
    } else {
    }
    %c0 = arith.constant 0 : index
    %c0_1 = arith.constant 0 : index
    %3 = vector.load %arg2[%c0, %c0_1] : memref<2x32xf32, #tpu.memory_space<vmem>>, vector<2x32xf32>
    %c0_2 = arith.constant 0 : index
    %c0_3 = arith.constant 0 : index
    %4 = vector.load %arg3[%c0_2, %c0_3] : memref<2x32xf32, #tpu.memory_space<vmem>>, vector<2x32xf32>
    %5 = arith.subf %3, %4 : vector<2x32xf32>
    %6 = math.absf %5 : vector<2x32xf32>
    %c0_4 = arith.constant 0 : index
    %c0_5 = arith.constant 0 : index
    %7 = vector.load %arg5[%c0_4, %c0_5] : memref<2x32xf32, #tpu.memory_space<vmem>>, vector<2x32xf32>
    %8 = arith.addf %7, %6 : vector<2x32xf32>
    %c0_6 = arith.constant 0 : index
    %c0_7 = arith.constant 0 : index
    %9 = vector.load %arg5[%c0_6, %c0_7] : memref<2x32xf32, #tpu.memory_space<vmem>>, vector<2x32xf32>
    tpu.vector_store %arg5[%c0_6, %c0_7], %8 {strides = array<i32>} : memref<2x32xf32, #tpu.memory_space<vmem>>, vector<2x32xf32>,
    %c0_i32_8 = arith.constant 0 : i32
    %10 = arith.cmpi eq, %arg1, %c0_i32_8 : i32
    %11 = arith.extui %10 : i1 to i32
    %c0_i32_9 = arith.constant 0 : i32
    %12 = arith.cmpi ne, %11, %c0_i32_9 : i32
    scf.if %12 {
      %c0_10 = arith.constant 0 : index
      %c0_11 = arith.constant 0 : index
      %13 = vector.load %arg5[%c0_10, %c0_11] : memref<2x32xf32, #tpu.memory_space<vmem>>, vector<2x32xf32>
      %c0_12 = arith.constant 0 : index
      %c0_13 = arith.constant 0 : index
      %14 = vector.load %arg4[%c0_12, %c0_13] : memref<2x32xf32, #tpu.memory_space<vmem>>, vector<2x32xf32>
      tpu.vector_store %arg4[%c0_12, %c0_13], %13 {strides = array<i32>} : memref<2x32xf32, #tpu.memory_space<vmem>>, vector<2x32xf32>,
    } else {
    }
    return
  }
  func.func @transform_0(%arg0: i32, %arg1: i32) -> (i32, i32) {
    %c0_i32 = arith.constant 0 : i32
    return %arg0, %arg1 : i32, i32
  }
  func.func @transform_1(%arg0: i32, %arg1: i32) -> (i32, i32) {
    %c0_i32 = arith.constant 0 : i32
    return %arg0, %arg1 : i32, i32
  }
  func.func @transform_2(%arg0: i32, %arg1: i32) -> (i32, i32) {
    %c0_i32 = arith.constant 0 : i32
    %c0_i32_0 = arith.constant 0 : i32
    return %arg0, %c0_i32 : i32, i32
  }
}

</mosaic_0001>

<bundles_post_ra>
// kernel: mae_loss.1
= control target key start
LH: loop header
LB: loop body
LE: loop exit
PB: predicated region body
PF: predicated region fallthrough
CT: control target
= control target key end

     0   :  { %vm15_vm0 = vcmask 254976   ;;  %v35_v0 = vmov 0.0   ;;  %s60_s0 = inlined_call_operand.vmem [shape: f32[2,32], index: 0, kind: input, shape index: {}]   ;;  %s61_s1 = inlined_call_operand.vmem [shape: f32[2,32], index: 1, kind: input, shape index: {}]   ;;  %s62_s2 = inlined_call_operand.vmem [shape: f32[2,32], index: 2, kind: output, shape index: {}]  }
   0x1   :  { %16 = vst.msk [vmem:[#allocation2] sm:$0x3] %vm15_vm0, %v35_v0  ;;  %v17_v1 = vld [vmem:[%s60_s0] sm:$0x3] }
   0x2   :  { %v18_v2 = vld [vmem:[%s61_s1] sm:$0x3] }
   0x3   :  { %v19_v3 = vsub.f32 %v17_v1, %v18_v2 }
   0x5   :  { %v20_v4 = vand.u32 2147483647, %v19_v3 }
   0x8   :  { %v21_v5 = vld [vmem:[#allocation2] sm:$0x3] }
   0x9   :  { %v22_v6 = vadd.f32 %v21_v5, %v20_v4 }
   0xb   :  { %24 = vst.msk [vmem:[#allocation2] sm:$0x3] %vm15_vm0, %v22_v6 }
  0x12   :  { %v28_v7 = vld [vmem:[#allocation2] sm:$0x3] }
  0x13   :  { %29 = vst.msk [vmem:[%s62_s2] sm:$0x3] %vm15_vm0, %v28_v7 }

</bundles_post_ra>
